<compile_context>
chip_gen: v7x
topology: tpu7x:2x2x1
jax: 0.10.0
libtpu: 0.0.40
codegen_flags: <defaults>
</compile_context>

<pallas_src>
import functools

import jax
import jax.numpy as jnp
import numpy as np
from jax.experimental import pallas as pl
from jax.experimental.pallas import tpu as pltpu


def _ceil_div(a, b):
    return -(-a // b)


def _tno_kernel(tri_ref, x_ref, t_ref, o_ref, carry_ref, *, seq_len, f32_path):
    """One (batch-group, d-chunk, seq-chunk) tile per grid step.

    tri_ref:   (S, S)       lower-triangular mask (constant index_map -> fetched once)
    x_ref:     (Bb, S, Bd)  input chunk for Bb batch entries
    t_ref:     (1, S, Bd)   taps for this sequence chunk (shared across the batch group)
    o_ref:     (Bb, S, Bd)  output chunk
    carry_ref: (Bb, 1, Bd)  f32 running sum of all previous seq chunks (VMEM scratch)
    """
    c = pl.program_id(2)  # sequence-chunk axis (innermost, "arbitrary")

    @pl.when(c == 0)
    def _():
        carry_ref[...] = jnp.zeros_like(carry_ref)

    tri = tri_ref[...]            # (S, S), bf16 (exact 0/1) or f32
    s = tri.shape[0]
    bb = x_ref.shape[0]

    taps = t_ref[0]               # (S, Bd)
    if f32_path:
        taps = taps.astype(jnp.float32)

    # Sequence-edge masking (only generated when S does not divide n). Garbage rows in a
    # partial edge block must be zeroed *before* the matmul: the tri matmul mixes rows,
    # and 0 * NaN would otherwise contaminate valid outputs. Lane (d) and batch edges need
    # no masking -- they never cross lanes / batch entries and are masked on store.
    mask = None
    if seq_len % s != 0:
        valid = seq_len - c * s
        rows = jax.lax.broadcasted_iota(jnp.int32, (s, 1), 0)
        mask = rows < valid

    for bi in range(bb):  # small static unroll (Bb <= 4)
        xb = x_ref[bi]                                    # (S, Bd)
        if f32_path:
            y = xb.astype(jnp.float32) * taps             # exact f32 products (VPU)
        else:
            # bf16 path: product in bf16 feeding the MXU with f32 accumulation.
            # Deliberate accuracy relaxation vs. the reference's f32 multiply.
            y = xb * taps
        if mask is not None:
            y = jnp.where(mask, y, jnp.zeros_like(y))

        # Within-chunk causal prefix sum as a lower-triangular matmul -> MXU, f32 acc.
        if f32_path:
            prefix = jnp.dot(tri, y, preferred_element_type=jnp.float32,
                             precision=jax.lax.Precision.HIGHEST)   # (S, Bd) f32
        else:
            prefix = jnp.dot(tri, y, preferred_element_type=jnp.float32)

        carry = carry_ref[bi]                             # (1, Bd) f32
        o_ref[bi] = (prefix + carry).astype(o_ref.dtype)
        # Last row of the triangular matmul is the full-chunk sum (f32, from the MXU):
        # reuse it for the carry instead of a separate XLU reduction.
        carry_ref[bi] = carry + prefix[s - 1:s, :]


def tno_naive(x, t, *, seq_block=None, d_block=None, batch_block=None):
    """x: (b, n, d), t: (1, 2*max(n,m)-2, d)  ->  o: (b, n, d)."""
    b, n, d = x.shape
    dtype = x.dtype
    is_bf16 = dtype == jnp.bfloat16
    mm_dtype = jnp.bfloat16 if is_bf16 else jnp.float32

    # ---- tile selection -------------------------------------------------------------
    # Sequence chunk: 256 for bf16; 128 for f32 (keeps v5e's multi-pass f32 MXU from
    # binding while costing nothing on mem-bound v6e/v7x).
    s_target = seq_block if seq_block is not None else (256 if is_bf16 else 128)
    S = n if n <= s_target else max(8, (s_target // 8) * 8)

    # Feature chunk: big (amortizes the ~0.35 us/step overhead) but lane-aligned and sized
    # so the whole double-buffered working set stays well under v7x's 64 MiB VMEM.
    bd_target = d_block if d_block is not None else 2048
    Bd = d if d <= bd_target else max(128, (bd_target // 128) * 128)

    # Batch group folded into the block: amortizes the t fetch across batch entries.
    Bb = min(b, batch_block if batch_block is not None else 4)

    # v7x megacore: keep >= 2 parallel grid slices when it is free to do so (halving Bd
    # does not change t traffic; it only makes steps thinner).
    if d_block is None and _ceil_div(b, Bb) * _ceil_div(d, Bd) < 2 and d >= 256:
        Bd = max(128, _ceil_div(_ceil_div(d, 2), 128) * 128)

    # t is passed whole (no wrapper slice / extra HBM round trip): the index_map only ever
    # addresses rows [0, n) (within 2n-2 for n >= 2). The only case where a slice is still
    # needed is a single sequence chunk with n not a multiple of 8, so the block's second
    # dim equals the operand's full dim (TPU (8,128) block-shape rule); t is tiny there.
    t_in = t
    if S % 8 != 0:
        t_in = t[:, :n, :]

    # Lower-triangular mask built once, outside the grid loop; constant index_map means it
    # is DMA'd once and stays VMEM-resident. bf16 (exact 0/1) for bf16 inputs -> native
    # MXU rate; f32 otherwise for tight accuracy.
    row = jnp.arange(S, dtype=jnp.int32)[:, None]
    col = jnp.arange(S, dtype=jnp.int32)[None, :]
    tri = (col <= row).astype(mm_dtype)                   # (S, S)

    grid = (_ceil_div(b, Bb), _ceil_div(d, Bd), _ceil_div(n, S))  # reduction axis last

    # Explicit VMEM budget: x/o/t double-buffered + tri + carry, with margin. Stays below
    # v7x's 64 MiB physical VMEM; also lifts v5e's 16 MiB default scoped limit when needed.
    x_bytes = int(jnp.dtype(dtype).itemsize)
    mm_bytes = int(jnp.dtype(mm_dtype).itemsize)
    est = (2 * (2 * Bb + 1) * S * Bd * x_bytes
           + 2 * S * S * mm_bytes
           + Bb * Bd * 4)
    vmem_limit = int(min(56 << 20, max(int(1.5 * est) + (2 << 20), 16 << 20)))

    kernel = functools.partial(_tno_kernel, seq_len=n, f32_path=not is_bf16)

    return pl.pallas_call(
        kernel,
        out_shape=jax.ShapeDtypeStruct((b, n, d), dtype),
        grid_spec=pltpu.PrefetchScalarGridSpec(
            num_scalar_prefetch=0,
            grid=grid,
            in_specs=[
                pl.BlockSpec((S, S), lambda i, j, c: (0, 0)),          # tri (constant)
                pl.BlockSpec((Bb, S, Bd), lambda i, j, c: (i, c, j)),  # x chunk
                pl.BlockSpec((1, S, Bd), lambda i, j, c: (0, c, j)),   # t taps chunk
            ],
            out_specs=pl.BlockSpec((Bb, S, Bd), lambda i, j, c: (i, c, j)),
            scratch_shapes=[pltpu.VMEM((Bb, 1, Bd), jnp.float32)],     # running carry
        ),
        compiler_params=pltpu.CompilerParams(
            dimension_semantics=("parallel", "parallel", "arbitrary"),
            vmem_limit_bytes=vmem_limit,
        ),
    )(tri, x, t_in)


def _reference(x, t):
    # o[i, u, j] = sum_{v<=u} t[0, v, j] * x[i, v, j]   (f32 multiply + f32 accumulate)
    n = x.shape[1]
    y = x.astype(jnp.float32) * t[:, :n, :].astype(jnp.float32)
    return jnp.cumsum(y, axis=1).astype(x.dtype)


def _reference_bf16(x, t):
    # Matches the kernel's documented bf16 relaxation: product rounded to bf16, f32 acc.
    n = x.shape[1]
    y = (x * t[:, :n, :]).astype(jnp.float32)
    return jnp.cumsum(y, axis=1).astype(x.dtype)


if __name__ == "__main__":
    key = jax.random.PRNGKey(0)
    k1, k2, k3, k4, k5, k6 = jax.random.split(key, 6)

    # --- test 1: the module's small shape (single chunk on every axis), f32 ---
    b, n, d = 2, 8, 32
    x = jax.random.normal(k1, (b, n, d), dtype=jnp.float32)
    t = jax.random.normal(k2, (1, 2 * n - 2, d), dtype=jnp.float32)
    out = jax.block_until_ready(tno_naive(x, t))
    np.testing.assert_allclose(np.asarray(out), np.asarray(_reference(x, t)),
                               rtol=1e-5, atol=1e-5)

    # --- test 2: f32, forced tiling on every axis (carry path + seq/d/batch edge blocks) ---
    b2, n2, d2 = 3, 20, 160
    x2 = jax.random.normal(k3, (b2, n2, d2), dtype=jnp.float32)
    t2 = jax.random.normal(k4, (1, 2 * n2 - 2, d2), dtype=jnp.float32)
    out2 = jax.block_until_ready(
        tno_naive(x2, t2, seq_block=8, d_block=128, batch_block=2))
    np.testing.assert_allclose(np.asarray(out2), np.asarray(_reference(x2, t2)),
                               rtol=1e-5, atol=1e-5)

    # --- test 3: bf16 path (bf16 MXU matmul, f32 carry), forced sequence chunking ---
    b3, n3, d3 = 2, 16, 128
    x3 = jax.random.normal(k5, (b3, n3, d3), dtype=jnp.bfloat16)
    t3 = jax.random.normal(k6, (1, 2 * n3 - 2, d3), dtype=jnp.bfloat16)
    out3 = jax.block_until_ready(tno_naive(x3, t3, seq_block=8))
    np.testing.assert_allclose(np.asarray(out3).astype(np.float32),
                               np.asarray(_reference_bf16(x3, t3)).astype(np.float32),
                               rtol=5e-2, atol=5e-2)

    print("KERNEL_OK")
</pallas_src>

<mosaic_0001>
module attributes {stable_mosaic.version = 11 : i64} {
  func.func @_tno_kernel(%arg0: i32, %arg1: i32, %arg2: i32, %arg3: memref<8x8xf32, #tpu.memory_space<vmem>>, %arg4: memref<2x8x32xf32, #tpu.memory_space<vmem>>, %arg5: memref<1x8x32xf32, #tpu.memory_space<vmem>>, %arg6: memref<2x8x32xf32, #tpu.memory_space<vmem>>, %arg7: memref<2x1x32xf32, #tpu.memory_space<vmem>>) attributes {dimension_semantics = [#tpu.dimension_semantics<parallel>, #tpu.dimension_semantics<parallel>, #tpu.dimension_semantics<arbitrary>], iteration_bounds = array<i64: 1, 1, 1>, scalar_prefetch = 0 : i64, scratch_operands = 1 : i64, tpu.core_type = #tpu.core_type<tc>, window_params = [{pipeline_mode = #tpu.pipeline_mode<synchronous>, transform_indices = @transform_0, window_bounds = array<i64: 8, 8>}, {transform_indices = @transform_1, window_bounds = array<i64: 2, 8, 32>}, {transform_indices = @transform_2, window_bounds = array<i64: 1, 8, 32>}, {transform_indices = @transform_3, window_bounds = array<i64: 2, 8, 32>}]} {
    %c0_i32 = arith.constant 0 : i32
    %0 = arith.cmpi eq, %arg2, %c0_i32 : i32
    %1 = arith.extui %0 : i1 to i32
    %c0_i32_0 = arith.constant 0 : i32
    %2 = arith.cmpi ne, %1, %c0_i32_0 : i32
    scf.if %2 {
      %cst_29 = arith.constant 0.000000e+00 : f32
      %38 = vector.broadcast %cst_29 : f32 to vector<2x1x32xf32>
      %c0_30 = arith.constant 0 : index
      %c0_31 = arith.constant 0 : index
      %c0_32 = arith.constant 0 : index
      %39 = vector.load %arg7[%c0_30, %c0_31, %c0_32] : memref<2x1x32xf32, #tpu.memory_space<vmem>>, vector<2x1x32xf32>
      tpu.vector_store %arg7[%c0_30, %c0_31, %c0_32], %38 {strides = array<i32>} : memref<2x1x32xf32, #tpu.memory_space<vmem>>, vector<2x1x32xf32>,
    } else {
    }
    %c0 = arith.constant 0 : index
    %c0_1 = arith.constant 0 : index
    %3 = vector.load %arg3[%c0, %c0_1] : memref<8x8xf32, #tpu.memory_space<vmem>>, vector<8x8xf32>
    %c0_2 = arith.constant 0 : index
    %c0_3 = arith.constant 0 : index
    %c0_4 = arith.constant 0 : index
    %4 = vector.load %arg5[%c0_2, %c0_3, %c0_4] : memref<1x8x32xf32, #tpu.memory_space<vmem>>, vector<1x8x32xf32>
    %5 = vector.shape_cast %4 : vector<1x8x32xf32> to vector<8x32xf32>
    %c0_5 = arith.constant 0 : index
    %c0_6 = arith.constant 0 : index
    %c0_7 = arith.constant 0 : index
    %6 = vector.load %arg4[%c0_5, %c0_6, %c0_7] : memref<2x8x32xf32, #tpu.memory_space<vmem>>, vector<1x8x32xf32>
    %7 = vector.shape_cast %6 : vector<1x8x32xf32> to vector<8x32xf32>
    %8 = arith.mulf %7, %5 : vector<8x32xf32>
    %cst = arith.constant dense<0.000000e+00> : vector<8x32xf32>
    %9 = tpu.matmul %3, %8, %cst {dimension_numbers = #tpu.dot_dimension_numbers<[1], [0], [0], [1], [0, 0, 1, 1], [], []>, precision = #tpu.contract_precision<fp32>} : vector<8x8xf32>, vector<8x32xf32>, vector<8x32xf32> -> vector<8x32xf32>
    %c0_8 = arith.constant 0 : index
    %c0_9 = arith.constant 0 : index
    %c0_10 = arith.constant 0 : index
    %10 = vector.load %arg7[%c0_8, %c0_9, %c0_10] : memref<2x1x32xf32, #tpu.memory_space<vmem>>, vector<1x1x32xf32>
    %11 = vector.shape_cast %10 : vector<1x1x32xf32> to vector<1x32xf32>
    %12 = vector.broadcast %11 : vector<1x32xf32> to vector<8x32xf32>
    %13 = arith.addf %9, %12 : vector<8x32xf32>
    %c0_11 = arith.constant 0 : index
    %c0_12 = arith.constant 0 : index
    %c0_13 = arith.constant 0 : index
    %14 = vector.load %arg6[%c0_11, %c0_12, %c0_13] : memref<2x8x32xf32, #tpu.memory_space<vmem>>, vector<1x8x32xf32>
    %15 = vector.shape_cast %14 : vector<1x8x32xf32> to vector<8x32xf32>
    %16 = vector.shape_cast %13 : vector<8x32xf32> to vector<1x8x32xf32>
    tpu.vector_store %arg6[%c0_11, %c0_12, %c0_13], %16 {strides = array<i32>} : memref<2x8x32xf32, #tpu.memory_space<vmem>>, vector<1x8x32xf32>,
    %17 = vector.extract_strided_slice %9 {offsets = [7, 0], sizes = [1, 32], strides = [1, 1]} : vector<8x32xf32> to vector<1x32xf32>
    %18 = arith.addf %11, %17 : vector<1x32xf32>
    %c0_14 = arith.constant 0 : index
    %c0_15 = arith.constant 0 : index
    %c0_16 = arith.constant 0 : index
    %19 = vector.load %arg7[%c0_14, %c0_15, %c0_16] : memref<2x1x32xf32, #tpu.memory_space<vmem>>, vector<1x1x32xf32>
    %20 = vector.shape_cast %19 : vector<1x1x32xf32> to vector<1x32xf32>
    %21 = vector.shape_cast %18 : vector<1x32xf32> to vector<1x1x32xf32>
    tpu.vector_store %arg7[%c0_14, %c0_15, %c0_16], %21 {strides = array<i32>} : memref<2x1x32xf32, #tpu.memory_space<vmem>>, vector<1x1x32xf32>,
    %c1 = arith.constant 1 : index
    %c0_17 = arith.constant 0 : index
    %c0_18 = arith.constant 0 : index
    %22 = vector.load %arg4[%c1, %c0_17, %c0_18] : memref<2x8x32xf32, #tpu.memory_space<vmem>>, vector<1x8x32xf32>
    %23 = vector.shape_cast %22 : vector<1x8x32xf32> to vector<8x32xf32>
    %24 = arith.mulf %23, %5 : vector<8x32xf32>
    %cst_19 = arith.constant dense<0.000000e+00> : vector<8x32xf32>
    %25 = tpu.matmul %3, %24, %cst_19 {dimension_numbers = #tpu.dot_dimension_numbers<[1], [0], [0], [1], [0, 0, 1, 1], [], []>, precision = #tpu.contract_precision<fp32>} : vector<8x8xf32>, vector<8x32xf32>, vector<8x32xf32> -> vector<8x32xf32>
    %c1_20 = arith.constant 1 : index
    %c0_21 = arith.constant 0 : index
    %c0_22 = arith.constant 0 : index
    %26 = vector.load %arg7[%c1_20, %c0_21, %c0_22] : memref<2x1x32xf32, #tpu.memory_space<vmem>>, vector<1x1x32xf32>
    %27 = vector.shape_cast %26 : vector<1x1x32xf32> to vector<1x32xf32>
    %28 = vector.broadcast %27 : vector<1x32xf32> to vector<8x32xf32>
    %29 = arith.addf %25, %28 : vector<8x32xf32>
    %c1_23 = arith.constant 1 : index
    %c0_24 = arith.constant 0 : index
    %c0_25 = arith.constant 0 : index
    %30 = vector.load %arg6[%c1_23, %c0_24, %c0_25] : memref<2x8x32xf32, #tpu.memory_space<vmem>>, vector<1x8x32xf32>
    %31 = vector.shape_cast %30 : vector<1x8x32xf32> to vector<8x32xf32>
    %32 = vector.shape_cast %29 : vector<8x32xf32> to vector<1x8x32xf32>
    tpu.vector_store %arg6[%c1_23, %c0_24, %c0_25], %32 {strides = array<i32>} : memref<2x8x32xf32, #tpu.memory_space<vmem>>, vector<1x8x32xf32>,
    %33 = vector.extract_strided_slice %25 {offsets = [7, 0], sizes = [1, 32], strides = [1, 1]} : vector<8x32xf32> to vector<1x32xf32>
    %34 = arith.addf %27, %33 : vector<1x32xf32>
    %c1_26 = arith.constant 1 : index
    %c0_27 = arith.constant 0 : index
    %c0_28 = arith.constant 0 : index
    %35 = vector.load %arg7[%c1_26, %c0_27, %c0_28] : memref<2x1x32xf32, #tpu.memory_space<vmem>>, vector<1x1x32xf32>
    %36 = vector.shape_cast %35 : vector<1x1x32xf32> to vector<1x32xf32>
    %37 = vector.shape_cast %34 : vector<1x32xf32> to vector<1x1x32xf32>
    tpu.vector_store %arg7[%c1_26, %c0_27, %c0_28], %37 {strides = array<i32>} : memref<2x1x32xf32, #tpu.memory_space<vmem>>, vector<1x1x32xf32>,
    return
  }
  func.func @transform_0(%arg0: i32, %arg1: i32, %arg2: i32) -> (i32, i32) {
    %c0_i32 = arith.constant 0 : i32
    %c0_i32_0 = arith.constant 0 : i32
    %c0_i32_1 = arith.constant 0 : i32
    return %c0_i32, %c0_i32_0 : i32, i32
  }
  func.func @transform_1(%arg0: i32, %arg1: i32, %arg2: i32) -> (i32, i32, i32) {
    %c0_i32 = arith.constant 0 : i32
    return %arg0, %arg2, %arg1 : i32, i32, i32
  }
  func.func @transform_2(%arg0: i32, %arg1: i32, %arg2: i32) -> (i32, i32, i32) {
    %c0_i32 = arith.constant 0 : i32
    %c0_i32_0 = arith.constant 0 : i32
    return %c0_i32, %arg2, %arg1 : i32, i32, i32
  }
  func.func @transform_3(%arg0: i32, %arg1: i32, %arg2: i32) -> (i32, i32, i32) {
    %c0_i32 = arith.constant 0 : i32
    return %arg0, %arg2, %arg1 : i32, i32, i32
  }
}

</mosaic_0001>

<bundles_post_ra>
// kernel: tpu_custom_call.1
= control target key start
LH: loop header
LB: loop body
LE: loop exit
PB: predicated region body
PF: predicated region fallthrough
CT: control target
= control target key end

     0   :  { %vm26_vm0 = vcmask 64512   ;;  %v1140_v3 = vmov 0.0   ;;  %vm19_vm1 = vcmask 253952   ;;  %s1232_s0 = inlined_call_operand.vmem [shape: f32[8,8], index: 0, kind: input, shape index: {}]   ;;  %s1233_s1 = inlined_call_operand.vmem [shape: f32[2,8,32], index: 1, kind: input, shape index: {}]   ;;  %s1234_s2 = inlined_call_operand.vmem [shape: f32[1,14,32], index: 2, kind: input, shape index: {}]   ;;  %s1235_s3 = inlined_call_operand.hbm [shape: f32[2,8,32], index: 3, kind: output, shape index: {}]  }
   0x1   :  { %v23_v0 = vld [vmem:[%s1234_s2] sm:$0xff]  ;;  %v1005_v2 = vld [vmem:[%s1233_s1 + $0x8] sm:$0xff]  ;;  %1030 = vmatprep.subr.mxu0 %v1140_v3  ;;  %1060 = vmatprep.subr.mxu1 %v1140_v3 }
   0x2   :  { %v24_v1 = vld [vmem:[%s1233_s1] sm:$0xff]  ;;  %v510_v5 = vmul.f32 %v1005_v2, %v23_v0 }
   0x3   :  { %v25_v4 = vmul.f32 %v24_v1, %v23_v0  ;;  %v22_v6 = vld [vmem:[%s1232_s0] sm:$0xff] }
   0x4   :  { %8 = vsyncpa [#allocation4], 0  ;;  %vm1141_vm2 = vmmov 0   ;;  %v28_v7 = vsel %vm26_vm0, %v22_v6, 0  ;;  %20 = vst.msk [vmem:[#allocation2] sm:$0x1] %vm19_vm1, %v1140_v3  ;;  %v478_v23 = vlaneseq }
   0x5   :  { %1032 = vmatprep.mubr.msk.f32.mxu0 %vm1141_vm2, %v1140_v3  ;;  %1062 = vmatprep.mubr.msk.f32.mxu1 %vm1141_vm2, %v1140_v3  ;;  %21 = vst.msk [vmem:[#allocation2 + $0x1] sm:$0x1] %vm19_vm1, %v1140_v3  ;;  %v31_v8 = vand.u32 4294901760, %v25_v4  ;;  %v512_v9 = vand.u32 4294901760, %v510_v5  ;;  %v96_v10 = vand.u32 4294901760, %v28_v7  ;;  %s1143_s0 = smov [#allocation3]  }
   0x6   :  { %v479_v24 = vshrl.u32 %v478_v23, 7  ;;  %v1142_v25 = vmov 1966171168   ;;  %s994_s1 = sshll.u32 %s1143_s0, 4  ;;  %vm484_vm3 = vcmask 261120   ;;  %s995_s1 = int_to_ptr.vmem [resolvable:$true] %s994_s1 }
   0x7   :  { %1031 = vmatpush3.msra.mxu0 %v31_v8  ;;  %v108_v11 = vsub.f32 %v25_v4, %v31_v8  ;;  %1061 = vmatpush3.msra.mxu1 %v512_v9  ;;  %v589_v12 = vsub.f32 %v510_v5, %v512_v9  ;;  %v97_v13 = vsub.f32 %v28_v7, %v96_v10  ;;  %v489_v26 = vunpack.c.l.s4 %v1142_v25  ;;  %s1116_s2 = scalar_lea.vmem %s995_s1, 256  ;;  %p1121_p1 = scmp.lt.s32.totalorder %s995_s1, %s995_s1 }
   0x8   :  { %1035 = vmatprep.subr.mxu0 %v1140_v3  ;;  %1065 = vmatprep.subr.mxu1 %v1140_v3  ;;  %v480_v27 = vsub.s32 0, %v479_v24  ;;  %p1117_p0 = scmp.ne.s32.totalorder %s995_s1, %s1116_s2  ;;  %p1122_p2 = scmp.lt.s32.totalorder %s1116_s2, %s1116_s2 }
   0x9   :  { %v98_v14 = vand.u32 4294901760, %v97_v13  ;;  %v109_v15 = vand.u32 4294901760, %v108_v11  ;;  %v590_v16 = vand.u32 4294901760, %v589_v12  ;;  %v490_v30 = vunpack.c.0.s8 %v489_v26 }
   0xa   :  { %p1123_p3 = por %p1122_p2, %p1121_p1 }
   0xb   :  { %v99_v17 = vsub.f32 %v97_v13, %v98_v14  ;;  %v110_v18 = vsub.f32 %v108_v11, %v109_v15  ;;  %v591_v19 = vsub.f32 %v589_v12, %v590_v16  ;;  %v476_v28 = vld [vmem:[#allocation2] sm:$0x1]  ;;  %v493_v33 = vsub.s32 %v490_v30, %v479_v24 }
   0xc   :  { %v958_v29 = vld [vmem:[#allocation2 + $0x1] sm:$0x1]  ;;  %v481_v31 = vrot.slane %v476_v28, %v480_v27  ;;  %p1124_p4 = pnand %p1123_p3, %p1117_p0 }
   0xd   :  { %v100_v20 = vand.u32 4294901760, %v99_v17  ;;  %v111_v21 = vand.u32 4294901760, %v110_v18  ;;  %v592_v22 = vand.u32 4294901760, %v591_v19  ;;  %v963_v32 = vrot.slane %v958_v29, %v480_v27 }
   0xf   :  { %1033 = vmatmul.mubr.f32.vlgmr.msra.gmra.mrb[0].mxu0 %v100_v20  ;;  %1063 = vmatmul.mubr.f32.vlgmr.msra.gmra.mrb[0].mxu1 %v100_v20 }
  0x10   :  { %1036 = vmatpush3.msra.mxu0 %v111_v21  ;;  %1066 = vmatpush3.msra.mxu1 %v592_v22 }
  0x11   :  { %1037 = vmatprep.mubr.msk.f32.mxu0 %vm1141_vm2, %v1140_v3  ;;  %1067 = vmatprep.mubr.msk.f32.mxu1 %vm1141_vm2, %v1140_v3 }
  0x12   :  { %1040 = vmatprep.subr.mxu0 %v1140_v3  ;;  %1070 = vmatprep.subr.mxu1 %v1140_v3 }
  0x17   :  { %1038 = vmatmul.mubr.f32.vlgmr.msra.gmra.mrb[0].mxu0 %v96_v10  ;;  %1068 = vmatmul.mubr.f32.vlgmr.msra.gmra.mrb[0].mxu1 %v96_v10 }
  0x18   :  { %1041 = vmatpush3.msra.mxu0 %v108_v11  ;;  %1071 = vmatpush3.msra.mxu1 %v589_v12 }
  0x19   :  { %1042 = vmatprep.mubr.msk.f32.mxu0 %vm1141_vm2, %v1140_v3  ;;  %1072 = vmatprep.mubr.msk.f32.mxu1 %vm1141_vm2, %v1140_v3 }
  0x1a   :  { %1045 = vmatprep.subr.mxu0 %v1140_v3  ;;  %1075 = vmatprep.subr.mxu1 %v1140_v3 }
  0x1f   :  { %1043 = vmatmul.mubr.f32.vlgmr.msra.gmra.mrb[0].mxu0 %v97_v13  ;;  %1073 = vmatmul.mubr.f32.vlgmr.msra.gmra.mrb[0].mxu1 %v97_v13 }
  0x20   :  { %1046 = vmatpush3.msra.mxu0 %v31_v8  ;;  %1076 = vmatpush3.msra.mxu1 %v512_v9 }
  0x21   :  { %1047 = vmatprep.mubr.msk.f32.mxu0 %vm1141_vm2, %v1140_v3  ;;  %1077 = vmatprep.mubr.msk.f32.mxu1 %vm1141_vm2, %v1140_v3 }
  0x22   :  { %1050 = vmatprep.subr.mxu0 %v1140_v3  ;;  %1080 = vmatprep.subr.mxu1 %v1140_v3 }
  0x27   :  { %1048 = vmatmul.mubr.f32.vlgmr.msra.gmra.mrb[0].mxu0 %v98_v14  ;;  %1078 = vmatmul.mubr.f32.vlgmr.msra.gmra.mrb[0].mxu1 %v98_v14 }
  0x28   :  { %1051 = vmatpush3.msra.mxu0 %v109_v15  ;;  %1081 = vmatpush3.msra.mxu1 %v590_v16 }
  0x29   :  { %1052 = vmatprep.mubr.msk.f32.mxu0 %vm1141_vm2, %v1140_v3  ;;  %1082 = vmatprep.mubr.msk.f32.mxu1 %vm1141_vm2, %v1140_v3 }
  0x2a   :  { %1055 = vmatprep.subr.mxu0 %v1140_v3  ;;  %1085 = vmatprep.subr.mxu1 %v1140_v3 }
  0x2f   :  { %1053 = vmatmul.mubr.f32.vlgmr.msra.gmra.mrb[0].mxu0 %v96_v10  ;;  %1083 = vmatmul.mubr.f32.vlgmr.msra.gmra.mrb[0].mxu1 %v96_v10 }
  0x30   :  { %1056 = vmatpush3.msra.mxu0 %v31_v8  ;;  %1086 = vmatpush3.msra.mxu1 %v512_v9 }
  0x31   :  { %1057 = vmatprep.mubr.msk.f32.mxu0 %vm1141_vm2, %v1140_v3  ;;  %1087 = vmatprep.mubr.msk.f32.mxu1 %vm1141_vm2, %v1140_v3 }
  0x37   :  { %1058 = vmatmul.mubr.f32.vlgmr.msra.gmra.mrb[0].mxu0 %v96_v10  ;;  %1088 = vmatmul.mubr.f32.vlgmr.msra.gmra.mrb[0].mxu1 %v96_v10 }
 0x10a   :  { %v472_v34 = vpop.f32.mrb[0].mxu0  ;;  %v953_v35 = vpop.f32.mrb[0].mxu1 }
 0x10b   :  { %v483_v36 = vadd.f32 %v481_v31, %v472_v34  ;;  %v487_v37 = vcombine.high %v472_v34, %v472_v34  ;;  %v965_v38 = vadd.f32 %v963_v32, %v953_v35  ;;  %v969_v39 = vcombine.high %v953_v35, %v953_v35  ;;  %v1059_v40 = vpop.f32.mrb[1].mxu0  ;;  %v1089_v41 = vpop.f32.mrb[1].mxu1 }
 0x10d   :  { %485 = vst.msk [vmem:[#allocation3] sm:$0xff] %vm484_vm3, %v483_v36  ;;  %v494_v42 = vrot.slane %v487_v37, %v493_v33  ;;  %967 = vst.msk [vmem:[#allocation3 + $0x8] sm:$0xff] %vm484_vm3, %v965_v38  ;;  %v976_v43 = vrot.slane %v969_v39, %v493_v33 }
 0x10e   :  { %1127 = shalt.err (!%p1124_p4)
}
 0x10f   :  { %s1128_s22 = scalar_lea.hbm %s1235_s3, 256 }
 0x110   :  { %p1129_p5 = scmp.ne.s32.totalorder %s1235_s3, %s1128_s22  ;;  %p1132_p6 = scmp.lt.u32.totalorder %s1128_s22, %s1235_s3 }
 0x112   :  { %p1134_p7 = pnand %p1132_p6, %p1129_p5 }
 0x114   :  { %1137 = shalt.err (!%p1134_p7)
}
 0x115   :  { %s1144_s27 = smov 128   ;;  %s1145_s28 = smov 8   ;;  %v495_v44 = vcombine.high %v494_v42, %v494_v42  ;;  %v977_v45 = vcombine.high %v976_v43, %v976_v43 }
 0x116   :  { %1000 = dma.vmem_to_hbm [thread:$0]  %s995_s1, 256, %s1235_s3, [#allocation4], %s1144_s27, %s1144_s27, %s1145_s28  }
 0x117   :  { %v502_v46 = vrot.slane %v495_v44, %v493_v33  ;;  %v984_v47 = vrot.slane %v977_v45, %v493_v33 }
 0x119   :  { %v503_v48 = vcombine.high %v502_v46, %v502_v46  ;;  %v985_v49 = vcombine.high %v984_v47, %v984_v47 }
 0x11b   :  { %v505_v50 = vadd.f32 %v503_v48, %v476_v28  ;;  %v987_v51 = vadd.f32 %v985_v49, %v958_v29 }
 0x11d   :  { %507 = vst.msk [vmem:[#allocation2] sm:$0x1] %vm19_vm1, %v505_v50  ;;  %988 = vst.msk [vmem:[#allocation2 + $0x1] sm:$0x1] %vm19_vm1, %v987_v51 }
 0x11e   :  { %1138 = dma.done.wait [#allocation4], 256  }
 0x11f   :  { %1139 = vsyncadd [#allocation4], 4294967040 }
 0x120   :  { %1004 = vsyncpa [#allocation4], 1 }

</bundles_post_ra>
